<compile_context>
chip_gen: v7x
topology: tpu7x:2x2x1
jax: 0.10.0
libtpu: 0.0.40
codegen_flags: <defaults>
</compile_context>

<pallas_src>
import functools

import jax
import jax.numpy as jnp
from jax.experimental import pallas as pl
from jax.experimental.pallas import tpu as pltpu


_LANE = 128
_SUBLANE = 8
_X_RESIDENT_BUDGET = 16 << 20   # cap for the double-buffered K-resident x block
_TILE_VMEM_BUDGET = 40 << 20    # total buffered footprint cap (fits v7x 64 MiB VMEM)


def _round_up(v, m):
    return ((v + m - 1) // m) * m


def _pick(dim, candidates):
    for c in candidates:
        if dim % c == 0:
            return c
    return candidates[-1]


def _footprint_bytes(tm, tn, tk, Fp):
    # 2x resident x block + 3x W tile + 2x bias row + 2x f32 output block.
    return 4 * (2 * tm * Fp + 3 * tk * tn + 2 * tn + 2 * tm * tn)


def _select_tiles(Bp, Cp, Fp):
    """Divisor-aware, lane-dense tiles; keeps the buffered footprint in budget."""
    tk = _pick(Fp, (2048, 1024, 512, 256, 128))
    tn = _pick(Cp, (512, 256, 128))
    tm = _pick(Bp, (512, 256, 128, 64, 32, 16, 8))

    # Keep the K-resident x block affordable (halving a power-of-two divisor
    # of Bp keeps divisibility).
    while tm > 8 and 2 * tm * Fp * 4 > _X_RESIDENT_BUDGET:
        tm //= 2
    # Safety net for the total double/triple-buffered footprint.
    while _footprint_bytes(tm, tn, tk, Fp) > _TILE_VMEM_BUDGET and tk > 128:
        tk //= 2
    while _footprint_bytes(tm, tn, tk, Fp) > _TILE_VMEM_BUDGET and tn > 128:
        tn //= 2
    while _footprint_bytes(tm, tn, tk, Fp) > _TILE_VMEM_BUDGET and tm > 8:
        tm //= 2

    # v7x has 2 TensorCores sharded over the "parallel" grid axes: expose at
    # least 2 parallel programs when the shapes allow it (no-op on v5e/v6e).
    if (Bp // tm) * (Cp // tn) == 1:
        if tn >= 256:
            tn //= 2
        elif tm >= 16:
            tm //= 2
    return tm, tn, tk


def _vmem_capacity_bytes():
    try:
        return int(pltpu.get_tpu_info().vmem_capacity_bytes)
    except Exception:
        return 64 << 20   # conservative default (v7x per-TensorCore VMEM)


def _dot_classifier_kernel(x_ref, w_ref, b_ref, o_ref, *, tk):
    """One (tm, tn) output tile; o_ref is resident across the K (feature) axis.

    x_ref: (tm, Fp)  K-resident batch tile (sliced per K step from VMEM)
    w_ref: (tk, tn)  scale-folded, pre-transposed weight tile (MXU-native)
    b_ref: (1, tn)   scale-folded bias row
    o_ref: (tm, tn)  f32 accumulator / output
    """
    k = pl.program_id(2)

    @pl.when(k == 0)
    def _():
        # Initialize the resident accumulator with the bias (epilogue-free).
        o_ref[...] = jnp.broadcast_to(b_ref[...], o_ref.shape)

    start = pl.multiple_of(k * tk, tk)
    o_ref[...] += jnp.dot(
        x_ref[:, pl.ds(start, tk)],
        w_ref[...],
        preferred_element_type=jnp.float32,
    )


def prepare_params(weight, bias, scales):
    """One-time (parameter-load-time) prep; NOT part of the per-call forward.

    Folds scales into the frozen fc params, transposes W to (F, C) MXU-native
    layout and pads everything to (8, 128) hardware granularity so the jitted
    forward never copies / pads the dominant weight operand.
    """
    C, F = weight.shape
    Cp = _round_up(C, _LANE)
    Fp = _round_up(F, _LANE)

    s = scales.astype(jnp.float32)
    w = weight.astype(jnp.float32) * s[:, None]      # fold scales into W rows
    b = bias.astype(jnp.float32) * s                 # fold scales into bias
    wt = w.T                                         # (F, C): contraction dim leading
    if (Fp, Cp) != (F, C):
        wt = jnp.pad(wt, ((0, Fp - F), (0, Cp - C)))
    if Cp != C:
        b = jnp.pad(b, (0, Cp - C))
    return {
        "wt": jax.device_put(wt),                    # (Fp, Cp)
        "b_row": jax.device_put(b.reshape(1, Cp)),   # (1, Cp)
        "num_classes": int(C),
        "feat_dim": int(F),
    }


@functools.partial(jax.jit, static_argnames=("num_classes", "feat_dim"))
def _forward_impl(x, wt, b_row, *, num_classes, feat_dim):
    B, F = x.shape
    assert F == feat_dim, "feature dim mismatch with prepared params"
    Fp, Cp = wt.shape
    out_dtype = x.dtype

    x = x.astype(jnp.float32)
    Bp = _round_up(B, _SUBLANE)
    if (Bp, Fp) != (B, F):
        # Activation-only padding (cheap; K padding is exact math because the
        # padded W rows are zero, batch padding is sliced off below).
        x = jnp.pad(x, ((0, Bp - B), (0, Fp - F)))

    tm, tn, tk = _select_tiles(Bp, Cp, Fp)
    grid = (Bp // tm, Cp // tn, Fp // tk)
    total_steps = grid[0] * grid[1] * grid[2]

    footprint = _footprint_bytes(tm, tn, tk, Fp)
    vmem_limit = min(max(footprint + (8 << 20), 32 << 20),
                     (_vmem_capacity_bytes() * 3) // 4)

    w_spec_kwargs = {}
    if total_steps >= 3:
        # Deeper buffering on the streamed (dominant) operand.
        w_spec_kwargs["pipeline_mode"] = pl.Buffered(3)

    out = pl.pallas_call(
        functools.partial(_dot_classifier_kernel, tk=tk),
        out_shape=jax.ShapeDtypeStruct((Bp, Cp), jnp.float32),
        grid_spec=pltpu.PrefetchScalarGridSpec(
            num_scalar_prefetch=0,
            grid=grid,
            in_specs=[
                # x: K-resident per batch tile -> one HBM pass over x.
                pl.BlockSpec((tm, Fp), lambda i, j, k: (i, 0)),
                # W: native streamed (tk, tn) tiles of the pre-transposed weight.
                pl.BlockSpec((tk, tn), lambda i, j, k: (k, j), **w_spec_kwargs),
                # bias row (scales already folded in).
                pl.BlockSpec((1, tn), lambda i, j, k: (0, j)),
            ],
            out_specs=pl.BlockSpec((tm, tn), lambda i, j, k: (i, j)),
        ),
        compiler_params=pltpu.CompilerParams(
            dimension_semantics=("parallel", "parallel", "arbitrary"),
            vmem_limit_bytes=int(vmem_limit),
        ),
    )(x, wt, b_row)

    out = out[:B, :num_classes]
    if out.dtype != out_dtype:
        out = out.astype(out_dtype)
    return out


def dot_product_classifier(x, params):
    """Pallas implementation of DotProduct_Classifier.forward: returns (out, None)."""
    out = _forward_impl(
        x, params["wt"], params["b_row"],
        num_classes=params["num_classes"], feat_dim=params["feat_dim"])
    return out, None


if __name__ == "__main__":
    key = jax.random.PRNGKey(0)
    kx, kw, kb, ks = jax.random.split(key, 4)

    def make_case(B, F, C):
        x = jax.random.normal(kx, (B, F), dtype=jnp.float32)
        bound = 1.0 / float(jnp.sqrt(F))
        w = jax.random.uniform(kw, (C, F), minval=-bound, maxval=bound,
                               dtype=jnp.float32)
        b = jax.random.uniform(kb, (C,), minval=-bound, maxval=bound,
                               dtype=jnp.float32)
        # Module initializes scales = ones; perturb deterministically so the
        # scaling path is actually exercised.
        s = jnp.ones((C,), dtype=jnp.float32) + 0.01 * jax.random.normal(
            ks, (C,), dtype=jnp.float32)
        return x, w, b, s

    # Small, representative shapes: aligned, ragged (padding path), and a case
    # with multiple K steps / multiple class tiles (accumulation path).
    cases = [(8, 256, 128), (6, 200, 100), (16, 384, 256)]
    for (B, F, C) in cases:
        x, w, b, s = make_case(B, F, C)
        params = prepare_params(w, b, s)          # one-time, load-time prep
        out, none_val = dot_product_classifier(x, params)
        out = jax.block_until_ready(out)
        ref = (x @ w.T + b) * s
        assert none_val is None
        assert out.shape == (B, C)
        assert jnp.allclose(out, ref, atol=1e-4, rtol=1e-4), f"mismatch at {(B, F, C)}"

    print("KERNEL_OK")
</pallas_src>

<mosaic_0001>
module attributes {stable_mosaic.version = 11 : i64} {
  func.func @_dot_classifier_kernel(%arg0: i32, %arg1: i32, %arg2: i32, %arg3: memref<8x256xf32, #tpu.memory_space<vmem>>, %arg4: memref<256x128xf32, #tpu.memory_space<vmem>>, %arg5: memref<1x128xf32, #tpu.memory_space<vmem>>, %arg6: memref<8x128xf32, #tpu.memory_space<vmem>>) attributes {dimension_semantics = [#tpu.dimension_semantics<parallel>, #tpu.dimension_semantics<parallel>, #tpu.dimension_semantics<arbitrary>], iteration_bounds = array<i64: 1, 1, 1>, scalar_prefetch = 0 : i64, scratch_operands = 0 : i64, tpu.core_type = #tpu.core_type<tc>, window_params = [{transform_indices = @transform_0, window_bounds = array<i64: 8, 256>}, {transform_indices = @transform_1, window_bounds = array<i64: 256, 128>}, {transform_indices = @transform_2, window_bounds = array<i64: 1, 128>}, {transform_indices = @transform_3, window_bounds = array<i64: 8, 128>}]} {
    %c0_i32 = arith.constant 0 : i32
    %0 = arith.cmpi eq, %arg2, %c0_i32 : i32
    %1 = arith.extui %0 : i1 to i32
    %c0_i32_0 = arith.constant 0 : i32
    %2 = arith.cmpi ne, %1, %c0_i32_0 : i32
    scf.if %2 {
      %c0_7 = arith.constant 0 : index
      %c0_8 = arith.constant 0 : index
      %12 = vector.load %arg5[%c0_7, %c0_8] : memref<1x128xf32, #tpu.memory_space<vmem>>, vector<1x128xf32>
      %13 = vector.shape_cast %12 : vector<1x128xf32> to vector<1x128xf32>
      %14 = vector.broadcast %13 : vector<1x128xf32> to vector<8x128xf32>
      %c0_9 = arith.constant 0 : index
      %c0_10 = arith.constant 0 : index
      %15 = vector.load %arg6[%c0_9, %c0_10] : memref<8x128xf32, #tpu.memory_space<vmem>>, vector<8x128xf32>
      tpu.vector_store %arg6[%c0_9, %c0_10], %14 {strides = array<i32>} : memref<8x128xf32, #tpu.memory_space<vmem>>, vector<8x128xf32>,
    } else {
    }
    %c256_i32 = arith.constant 256 : i32
    %3 = arith.muli %arg2, %c256_i32 : i32
    %4 = tpu.assume_multiple %3, 256 : i32
    %c0 = arith.constant 0 : index
    %c0_1 = arith.constant 0 : index
    %5 = vector.load %arg6[%c0, %c0_1] : memref<8x128xf32, #tpu.memory_space<vmem>>, vector<8x128xf32>
    %c0_2 = arith.constant 0 : index
    %6 = arith.index_cast %4 : i32 to index
    %7 = vector.load %arg3[%c0_2, %6] : memref<8x256xf32, #tpu.memory_space<vmem>>, vector<8x256xf32>
    %c0_3 = arith.constant 0 : index
    %c0_4 = arith.constant 0 : index
    %8 = vector.load %arg4[%c0_3, %c0_4] : memref<256x128xf32, #tpu.memory_space<vmem>>, vector<256x128xf32>
    %cst = arith.constant dense<0.000000e+00> : vector<8x128xf32>
    %9 = tpu.matmul %7, %8, %cst {dimension_numbers = #tpu.dot_dimension_numbers<[1], [0], [0], [1], [0, 0, 1, 1], [], []>} : vector<8x256xf32>, vector<256x128xf32>, vector<8x128xf32> -> vector<8x128xf32>
    %10 = arith.addf %5, %9 : vector<8x128xf32>
    %c0_5 = arith.constant 0 : index
    %c0_6 = arith.constant 0 : index
    %11 = vector.load %arg6[%c0_5, %c0_6] : memref<8x128xf32, #tpu.memory_space<vmem>>, vector<8x128xf32>
    tpu.vector_store %arg6[%c0_5, %c0_6], %10 {strides = array<i32>} : memref<8x128xf32, #tpu.memory_space<vmem>>, vector<8x128xf32>,
    return
  }
  func.func @transform_0(%arg0: i32, %arg1: i32, %arg2: i32) -> (i32, i32) {
    %c0_i32 = arith.constant 0 : i32
    %c0_i32_0 = arith.constant 0 : i32
    return %arg0, %c0_i32 : i32, i32
  }
  func.func @transform_1(%arg0: i32, %arg1: i32, %arg2: i32) -> (i32, i32) {
    %c0_i32 = arith.constant 0 : i32
    return %arg2, %arg1 : i32, i32
  }
  func.func @transform_2(%arg0: i32, %arg1: i32, %arg2: i32) -> (i32, i32) {
    %c0_i32 = arith.constant 0 : i32
    %c0_i32_0 = arith.constant 0 : i32
    return %c0_i32, %arg1 : i32, i32
  }
  func.func @transform_3(%arg0: i32, %arg1: i32, %arg2: i32) -> (i32, i32) {
    %c0_i32 = arith.constant 0 : i32
    return %arg0, %arg1 : i32, i32
  }
}

</mosaic_0001>

<bundles_post_ra>
// kernel: _forward_impl.1
= control target key start
LH: loop header
LB: loop body
LE: loop exit
PB: predicated region body
PF: predicated region fallthrough
CT: control target
= control target key end

     0   :  { %8 = vsyncpa [#allocation3], 0  ;;  %s399_s0 = inlined_call_operand.hbm [shape: f32[8,256], index: 0, kind: input, shape index: {}]   ;;  %s400_s1 = inlined_call_operand.hbm [shape: f32[256,128], index: 1, kind: input, shape index: {}]   ;;  %s401_s2 = inlined_call_operand.vmem [shape: f32[1,128], index: 2, kind: input, shape index: {}]   ;;  %s402_s3 = inlined_call_operand.hbm [shape: f32[8,128], index: 3, kind: output, shape index: {}]  }
   0x1   :  { %9 = vsyncpa [#allocation6], 0 }
   0x2   :  { %10 = vsyncpa [#allocation4], 0  ;;  %s328_s12 = smov [#allocation2]   ;;  %s329_s14 = smov [#allocation5]  }
   0x3   :  { %s17_s13 = sshll.u32 %s328_s12, 4  ;;  %s26_s15 = sshll.u32 %s329_s14, 4  ;;  %s18_s13 = int_to_ptr.vmem [resolvable:$true] %s17_s13  ;;  %s353_s15 = int_to_ptr.vmem [resolvable:$true] %s26_s15 }
   0x4   :  { %s256_s18 = scalar_lea.hbm %s399_s0, 256 }
   0x5   :  { %p257_p0 = scmp.ne.s32.totalorder %s399_s0, %s256_s18  ;;  %p260_p1 = scmp.lt.u32.totalorder %s256_s18, %s399_s0 }
   0x7   :  { %p262_p2 = pnand %p260_p1, %p257_p0 }
   0x9   :  { %265 = shalt.err (!%p262_p2)
}
   0xa   :  { %s266_s23 = scalar_lea.vmem %s18_s13, 256  ;;  %p271_p4 = scmp.lt.s32.totalorder %s18_s13, %s18_s13 }
   0xb   :  { %p267_p3 = scmp.ne.s32.totalorder %s18_s13, %s266_s23  ;;  %p272_p5 = scmp.lt.s32.totalorder %s266_s23, %s266_s23 }
   0xd   :  { %p273_p6 = por %p272_p5, %p271_p4 }
   0xf   :  { %p274_p7 = pnand %p273_p6, %p267_p3 }
  0x11   :  { %277 = shalt.err (!%p274_p7)
}
  0x12   :  { %20 = dma.hbm_to_vmem [thread:$0]  %s399_s0, 256, %s18_s13, [#allocation3]  }
  0x13   :  { %s278_s28 = scalar_lea.hbm %s400_s1, 4096 }
  0x14   :  { %p279_p8 = scmp.ne.s32.totalorder %s400_s1, %s278_s28  ;;  %p282_p9 = scmp.lt.u32.totalorder %s278_s28, %s400_s1 }
  0x16   :  { %p284_p10 = pnand %p282_p9, %p279_p8 }
  0x18   :  { %287 = shalt.err (!%p284_p10)
}
  0x19   :  { %s288_s6 = scalar_lea.vmem %s353_s15, 4096  ;;  %p293_p12 = scmp.lt.s32.totalorder %s353_s15, %s353_s15 }
  0x1a   :  { %p289_p11 = scmp.ne.s32.totalorder %s353_s15, %s288_s6  ;;  %p294_p13 = scmp.lt.s32.totalorder %s288_s6, %s288_s6 }
  0x1c   :  { %p295_p0 = por %p294_p13, %p293_p12 }
  0x1e   :  { %p296_p1 = pnand %p295_p0, %p289_p11 }
  0x20   :  { %299 = shalt.err (!%p296_p1)
}
  0x21   :  { %s330_s0 = smov 128   ;;  %s331_s7 = smov 8  }
  0x22   :  { %32 = dma.hbm_to_vmem [thread:$0]  %s400_s1, 4096, %s353_s15, [#allocation6], %s330_s0, %s330_s0, %s331_s7  }
  0x23   :  { %322 = dma.done.wait [#allocation3], 256  }
  0x24   :  { %323 = vsyncadd [#allocation3], 4294967040 }
  0x25   :  { %324 = dma.done.wait [#allocation6], 4096  }
  0x26   :  { %325 = vsyncadd [#allocation6], 4294963200  ;;  %v77_v0 = vld [vmem:[#allocation5 + $0x80] sm:$0xff]  ;;  %v78_v1 = vld [vmem:[#allocation5 + $0x88] sm:$0xff]  ;;  %s332_s11 = smov [#allocation7]  }
  0x27   :  { %v61_v2 = vld [vmem:[#allocation5] sm:$0xff]  ;;  %v219_v3 = vpack.c.bf16 %v78_v1, %v77_v0  ;;  %v62_v4 = vld [vmem:[#allocation5 + $0x8] sm:$0xff]  ;;  %v79_v5 = vld [vmem:[#allocation5 + $0x90] sm:$0xff]  ;;  %s171_s12 = sshll.u32 %s332_s11, 4  ;;  %s172_s12 = int_to_ptr.vmem [resolvable:$true] %s171_s12 }
  0x28   :  { %v80_v6 = vld [vmem:[#allocation5 + $0x98] sm:$0xff]  ;;  %v221_v7 = vpack.c.bf16 %v62_v4, %v61_v2  ;;  %v63_v9 = vld [vmem:[#allocation5 + $0x10] sm:$0xff]  ;;  %v81_v11 = vld [vmem:[#allocation5 + $0xa0] sm:$0xff]  ;;  %s300_s13 = scalar_lea.vmem %s172_s12, 128  ;;  %p305_p3 = scmp.lt.s32.totalorder %s172_s12, %s172_s12 }
  0x29   :  { %v223_v8 = vpack.c.bf16 %v80_v6, %v79_v5  ;;  %v64_v10 = vld [vmem:[#allocation5 + $0x18] sm:$0xff]  ;;  %220 = vmatprep.subr.bf16.mxu0 %v219_v3  ;;  %v82_v12 = vld [vmem:[#allocation5 + $0xa8] sm:$0xff]  ;;  %v65_v15 = vld [vmem:[#allocation5 + $0x20] sm:$0xff]  ;;  %p301_p2 = scmp.ne.s32.totalorder %s172_s12, %s300_s13  ;;  %p306_p4 = scmp.lt.s32.totalorder %s300_s13, %s300_s13 }
  0x2a   :  { %222 = vmatpush3.bf16.msra.mxu0 %v221_v7  ;;  %v225_v13 = vpack.c.bf16 %v64_v10, %v63_v9  ;;  %v227_v14 = vpack.c.bf16 %v82_v12, %v81_v11  ;;  %v66_v16 = vld [vmem:[#allocation5 + $0x28] sm:$0xff]  ;;  %v83_v17 = vld [vmem:[#allocation5 + $0xb0] sm:$0xff]  ;;  %v84_v18 = vld [vmem:[#allocation5 + $0xb8] sm:$0xff] }
  0x2b   :  { %224 = vmatprep.subr.bf16.mxu0 %v223_v8  ;;  %v229_v19 = vpack.c.bf16 %v66_v16, %v65_v15  ;;  %v231_v20 = vpack.c.bf16 %v84_v18, %v83_v17  ;;  %v67_v21 = vld [vmem:[#allocation5 + $0x30] sm:$0xff]  ;;  %v68_v22 = vld [vmem:[#allocation5 + $0x38] sm:$0xff]  ;;  %v85_v23 = vld [vmem:[#allocation5 + $0xc0] sm:$0xff]  ;;  %p307_p5 = por %p306_p4, %p305_p3 }
  0x2c   :  { %v86_v24 = vld [vmem:[#allocation5 + $0xc8] sm:$0xff]  ;;  %v60_v25 = vld [vmem:[#allocation2 + $0x8] sm:$0xff]  ;;  %v233_v26 = vpack.c.bf16 %v68_v22, %v67_v21  ;;  %v69_v28 = vld [vmem:[#allocation5 + $0x40] sm:$0xff] }
  0x2d   :  { %157 = vmatprep.mubr.f32.mxu0 %v60_v25  ;;  %v235_v27 = vpack.c.bf16 %v86_v24, %v85_v23  ;;  %v70_v29 = vld [vmem:[#allocation5 + $0x48] sm:$0xff]  ;;  %v87_v30 = vld [vmem:[#allocation5 + $0xd0] sm:$0xff]  ;;  %v88_v31 = vld [vmem:[#allocation5 + $0xd8] sm:$0xff]  ;;  %p308_p6 = pnand %p307_p5, %p301_p2 }
  0x2e   :  { %226 = vmatpush3.bf16.msra.mxu0 %v225_v13  ;;  %v237_v32 = vpack.c.bf16 %v70_v29, %v69_v28  ;;  %v239_v33 = vpack.c.bf16 %v88_v31, %v87_v30  ;;  %v71_v34 = vld [vmem:[#allocation5 + $0x50] sm:$0xff]  ;;  %v72_v35 = vld [vmem:[#allocation5 + $0x58] sm:$0xff]  ;;  %v89_v36 = vld [vmem:[#allocation5 + $0xe0] sm:$0xff] }
  0x2f   :  { %228 = vmatprep.subr.bf16.mxu0 %v227_v14  ;;  %v90_v37 = vld [vmem:[#allocation5 + $0xe8] sm:$0xff]  ;;  %v241_v38 = vpack.c.bf16 %v72_v35, %v71_v34  ;;  %v73_v40 = vld [vmem:[#allocation5 + $0x60] sm:$0xff]  ;;  %v91_v42 = vld [vmem:[#allocation5 + $0xf0] sm:$0xff] }
  0x30   :  { %v243_v39 = vpack.c.bf16 %v90_v37, %v89_v36  ;;  %v74_v41 = vld [vmem:[#allocation5 + $0x68] sm:$0xff]  ;;  %v92_v43 = vld [vmem:[#allocation5 + $0xf8] sm:$0xff]  ;;  %v75_v46 = vld [vmem:[#allocation5 + $0x70] sm:$0xff] }
  0x31   :  { %v245_v44 = vpack.c.bf16 %v74_v41, %v73_v40  ;;  %v247_v45 = vpack.c.bf16 %v92_v43, %v91_v42  ;;  %v76_v47 = vld [vmem:[#allocation5 + $0x78] sm:$0xff]  ;;  %v59_v49 = vld [vmem:[#allocation2] sm:$0xff] }
  0x32   :  { %230 = vmatpush3.bf16.msra.mxu0 %v229_v19  ;;  %v249_v48 = vpack.c.bf16 %v76_v47, %v75_v46  ;;  %v183_v51 = vld [vmem:[%s401_s2] ss:$0 sm:$0xff] }
  0x33   :  { %232 = vmatprep.subr.bf16.mxu0 %v231_v20 }
  0x36   :  { %234 = vmatpush3.bf16.msra.mxu0 %v233_v26 }
  0x37   :  { %236 = vmatprep.subr.bf16.mxu0 %v235_v27 }
  0x3a   :  { %238 = vmatpush3.bf16.msra.mxu0 %v237_v32 }
  0x3b   :  { %240 = vmatprep.subr.bf16.mxu0 %v239_v33 }
  0x3e   :  { %242 = vmatpush3.bf16.msra.mxu0 %v241_v38 }
  0x3f   :  { %244 = vmatprep.subr.bf16.mxu0 %v243_v39 }
  0x42   :  { %246 = vmatpush3.bf16.msra.mxu0 %v245_v44 }
  0x43   :  { %248 = vmatprep.subr.bf16.mxu0 %v247_v45 }
  0x46   :  { %250 = vmatpush3.bf16.msra.mxu0 %v249_v48 }
  0x49   :  { %158 = vmatmul.mubr.f32.vlgmr.msra.gmra.mrb[0].mxu0 %v59_v49 }
 0x11c   :  { %v216_v50 = vpop.f32.mrb[0].mxu0 }
 0x11d   :  { %v217_v52 = vpop.f32.mrb[1].mxu0 }
 0x11e   :  { %v218_v53 = vadd.f32 %v217_v52, %v216_v50 }
 0x120   :  { %v163_v54 = vadd.f32 %v218_v53, %v183_v51 }
 0x122   :  { %164 = vst [vmem:[#allocation7] sm:$0xff] %v163_v54 }
 0x123   :  { %311 = shalt.err (!%p308_p6)
}
 0x124   :  { %s312_s16 = scalar_lea.hbm %s402_s3, 128 }
 0x125   :  { %p313_p7 = scmp.ne.s32.totalorder %s402_s3, %s312_s16  ;;  %p316_p8 = scmp.lt.u32.totalorder %s312_s16, %s402_s3 }
 0x127   :  { %p318_p9 = pnand %p316_p8, %p313_p7 }
 0x129   :  { %321 = shalt.err (!%p318_p9)
}
 0x12a   :  { %174 = dma.vmem_to_hbm [thread:$0]  %s172_s12, 128, %s402_s3, [#allocation4]  }
 0x12b   :  { %326 = dma.done.wait [#allocation4], 128  }
 0x12c   :  { %327 = vsyncadd [#allocation4], 4294967168 }
 0x12d   :  { %178 = vsyncpa [#allocation3], 1 }
 0x12e   :  { %179 = vsyncpa [#allocation6], 1 }
 0x12f   :  { %180 = vsyncpa [#allocation4], 1 }

</bundles_post_ra>
